<compile_context>
chip_gen: v7x
topology: tpu7x:2x2x1
jax: 0.10.0
libtpu: 0.0.40
codegen_flags: <defaults>
</compile_context>

<pallas_src>
import functools

import jax
import jax.numpy as jnp
from jax.experimental import pallas as pl
from jax.experimental.pallas import tpu as pltpu

HEADS = 4
ATT_NEG_SLOPE = 0.2    # GATConv internal LeakyReLU slope
OUT_NEG_SLOPE = 0.01   # torch.nn.LeakyReLU default slope


# ----------------------------- device heuristics -----------------------------

def _device_kind():
    try:
        return jax.devices()[0].device_kind.lower()
    except Exception:
        return ""


def _default_attn_dtype():
    """bf16 for the N^2 softmax math on v6e/v7x; f32 on v5e and older
    (no bf16 VPU/EUP before v6e)."""
    kind = _device_kind()
    if any(v in kind for v in ("v2", "v3", "v4", "v5")):
        return jnp.float32
    return jnp.bfloat16


def _vmem_limit_bytes():
    """Per-generation scoped-VMEM cap.
    v7x: 64 MiB physical -> keep 48 MiB with headroom for compiler scratch.
    v5e/v6e: 128 MiB physical -> ~100 MiB so the tile sweep can pick 512-1024
    row tiles (near the HBM roofline instead of the 128-256 row knee)."""
    kind = _device_kind()
    if "v7" in kind:
        return 48 * 1024 * 1024
    if any(v in kind for v in ("v2", "v3")):
        return 12 * 1024 * 1024
    if "v4" in kind:
        return 64 * 1024 * 1024
    return 100 * 1024 * 1024


def _min_row_tiles():
    """v7x has 2 TensorCores; keep >= 2 row tiles so the parallel grid axis
    can be sharded across both."""
    return 2 if "v7" in _device_kind() else 1


def _choose_tile_i(n, heads, hidden, attn_itemsize, vmem_limit, min_tiles=1):
    """Largest 128-multiple dest-row tile fitting ~half the VMEM budget.

    Only one head's [T, N] e/p temporaries are live at a time (heads are a
    grid axis), so the estimate is: double-buffered bf16 mask row-slab + e + p
    + the small resident per-head tables."""
    budget = vmem_limit // 2
    cap = -(-n // 128) * 128
    best = 128
    for t in (128, 256, 512, 1024):
        if t > cap:
            break
        n_pad = -(-n // t) * t
        if min_tiles > 1 and n > 128 and (n_pad // t) < min_tiles:
            break
        need = 2 * t * n_pad * 2                   # mask rows, bf16, double-buffered
        need += 2 * t * n_pad * attn_itemsize      # e / p (single head live)
        need += heads * n_pad * (hidden + 4) * 4   # resident h_agg + alpha tables
        if need <= budget:
            best = t
        else:
            break
    return best


# --------------------------------- kernel ------------------------------------

def gat_kernel(alpha_src_ref, alpha_dst_ref, mask_ref, h_agg_ref, bias_ref,
               pool_ref, out_ref, *, hidden, attn_dtype):
    f32 = jnp.float32
    h = pl.program_id(1)                                   # current head

    a_src = alpha_src_ref[h]                               # [1, N]  attn_dtype
    a_dst = alpha_dst_ref[h]                               # [T, 1]  attn_dtype
    mask = mask_ref[...].astype(attn_dtype)                # [T, N]  0 / -1e30

    # e[i, j] = LeakyReLU(alpha_dst[i] + alpha_src[j], 0.2) + mask[i, j]
    # max-form LeakyReLU: 2 VALU ops instead of cmp+mul+select on the N^2 path.
    e = a_dst + a_src
    e = jnp.maximum(e, ATT_NEG_SLOPE * e) + mask
    e_max = jnp.max(e, axis=-1, keepdims=True)
    p = jnp.exp(e - e_max)                                 # masked entries exactly 0

    # Numerator AND softmax denominator from one MXU matmul: the last column of
    # h_agg is all ones, so no N^2 elementwise multiply / XLU row-sum is needed.
    hh = h_agg_ref[h]                                      # [N, C+1]  bf16
    agg = jnp.dot(p.astype(jnp.bfloat16), hh,
                  preferred_element_type=f32)              # [T, C+1]  f32

    inv = pl.reciprocal(agg[:, hidden:hidden + 1], approx=True)    # EUP slot
    out_h = agg[:, :hidden] * inv + bias_ref[h]            # [T, C]  (conv bias)
    out_h = jnp.maximum(out_h, OUT_NEG_SLOPE * out_h)      # output LeakyReLU

    # Partial global_mean_pool for this (row tile, head): [B, C].
    out_ref[...] = jnp.dot(pool_ref[...], out_h,
                           preferred_element_type=f32)[None, None]


# --------------------------------- wrapper -----------------------------------

def gat_forward(x, edge_index, batch, batch_size, params, *, heads, hidden,
                num_classes, tile_i=None, attn_dtype=None):
    """Host glue: hoisted x@W / alpha projections, dense bf16 mask, padding,
    tiled pallas_call over (row_tiles, heads), tiny host-side epilogue."""
    del num_classes  # final Linear shape comes from params["lin_w"]
    n, f = x.shape
    hc = heads * hidden

    if attn_dtype is None:
        attn_dtype = _default_attn_dtype()
    vmem_limit = _vmem_limit_bytes()
    if tile_i is None:
        tile_i = _choose_tile_i(n, heads, hidden,
                                jnp.dtype(attn_dtype).itemsize, vmem_limit,
                                min_tiles=_min_row_tiles())
    assert tile_i % 128 == 0 and tile_i > 0
    n_pad = -(-n // tile_i) * tile_i
    num_tiles = n_pad // tile_i

    # ---- Hoisted node transform + attention projections (plain XLA, O(N)) ----
    x_p = jnp.zeros((n_pad, f), jnp.float32).at[:n, :].set(x.astype(jnp.float32))
    h_all = (x_p @ params["w"].astype(jnp.float32)).reshape(n_pad, heads, hidden)

    a_src = jnp.einsum("nhc,hc->hn", h_all, params["att_src"])      # [H, N]
    a_dst = jnp.einsum("nhc,hc->hn", h_all, params["att_dst"])      # [H, N]
    alpha_src = a_src[:, None, :].astype(attn_dtype)                # [H, 1, N]
    alpha_dst = a_dst[:, :, None].astype(attn_dtype)                # [H, N, 1]

    # Per-head features + ones column (softmax denominator rides the MXU),
    # stored bf16 for the aggregation matmul on every generation.
    h_agg = jnp.concatenate(
        [h_all, jnp.ones((n_pad, heads, 1), jnp.float32)], axis=-1)
    h_agg = jnp.transpose(h_agg, (1, 0, 2)).astype(jnp.bfloat16)    # [H, N, C+1]

    # Dense additive adjacency mask built directly in bf16 (no f32 O(N^2)
    # intermediates): 0 on edges j->i and on self loops, -1e30 elsewhere.
    src, dst = edge_index[0], edge_index[1]
    diag = jnp.arange(n_pad)
    mask_bias = jnp.full((n_pad, n_pad), -1e30, jnp.bfloat16)
    mask_bias = mask_bias.at[dst, src].set(0.0).at[diag, diag].set(0.0)

    # global_mean_pool as [B, N_pad] (column-tiled; padded columns are 0).
    onehot = (batch[None, :] == jnp.arange(batch_size)[:, None]).astype(jnp.float32)
    counts = jnp.maximum(jnp.sum(onehot, axis=1, keepdims=True), 1.0)
    pool = jnp.zeros((batch_size, n_pad), jnp.float32).at[:, :n].set(onehot / counts)

    bias_h = params["bias"].reshape(heads, hidden)[:, None, :].astype(jnp.float32)

    kernel = pl.pallas_call(
        functools.partial(gat_kernel, hidden=hidden, attn_dtype=attn_dtype),
        out_shape=jax.ShapeDtypeStruct(
            (num_tiles, heads, batch_size, hidden), jnp.float32),
        grid=(num_tiles, heads),   # heads innermost: mask slab reused across heads
        in_specs=[
            pl.BlockSpec((heads, 1, n_pad), lambda i, h: (0, 0, 0)),          # alpha_src (resident)
            pl.BlockSpec((heads, tile_i, 1), lambda i, h: (0, i, 0)),         # alpha_dst rows
            # TODO(synk): if profiling shows exposed mask-DMA waits on v6e, add
            # pipeline_mode=pl.Buffered(3) here and budget one more mask tile.
            pl.BlockSpec((tile_i, n_pad), lambda i, h: (i, 0)),               # mask rows (bf16)
            pl.BlockSpec((heads, n_pad, hidden + 1), lambda i, h: (0, 0, 0)),  # h_agg (resident)
            pl.BlockSpec((heads, 1, hidden), lambda i, h: (0, 0, 0)),         # conv bias (resident)
            pl.BlockSpec((batch_size, tile_i), lambda i, h: (0, i)),          # pool columns
        ],
        out_specs=pl.BlockSpec((1, 1, batch_size, hidden),
                               lambda i, h: (i, h, 0, 0)),
        compiler_params=pltpu.CompilerParams(
            dimension_semantics=("parallel", "parallel"),
            vmem_limit_bytes=vmem_limit),
    )
    pooled_parts = kernel(alpha_src, alpha_dst, mask_bias, h_agg, bias_h, pool)

    # Tiny host-side epilogue: sum row-tile partials, concat heads, final Linear.
    pooled = jnp.sum(pooled_parts, axis=0)                          # [H, B, C]
    pooled = jnp.transpose(pooled, (1, 0, 2)).reshape(batch_size, hc)
    return pooled @ params["lin_w"] + params["lin_b"]


# -------------------------------- reference ----------------------------------

def gat_reference(x, edge_index, batch, batch_size, params, *, heads, hidden):
    """Pure-JAX dense f32 reference for correctness checking."""
    n = x.shape[0]
    src, dst = edge_index[0], edge_index[1]
    adj = jnp.zeros((n, n), jnp.float32).at[dst, src].set(1.0)
    adj = jnp.maximum(adj, jnp.eye(n, dtype=jnp.float32))

    h_all = x @ params["w"]                                  # [N, H*C]
    h = h_all.reshape(n, heads, hidden)                      # [N, H, C]
    a_src = jnp.einsum("nhc,hc->nh", h, params["att_src"])   # [N, H]
    a_dst = jnp.einsum("nhc,hc->nh", h, params["att_dst"])   # [N, H]
    e = a_dst[:, None, :] + a_src[None, :, :]                # [N(i), N(j), H]
    e = jnp.where(e > 0, e, ATT_NEG_SLOPE * e)
    e = jnp.where(adj[:, :, None] > 0, e, -1e30)
    e = e - jnp.max(e, axis=1, keepdims=True)
    p = jnp.exp(e)
    p = jnp.where(adj[:, :, None] > 0, p, 0.0)
    attn = p / jnp.sum(p, axis=1, keepdims=True)             # [N, N, H]
    out = jnp.einsum("ijh,jhc->ihc", attn, h).reshape(n, heads * hidden)
    out = out + params["bias"][0]
    out = jnp.where(out > 0, out, OUT_NEG_SLOPE * out)

    onehot = (batch[None, :] == jnp.arange(batch_size)[:, None]).astype(jnp.float32)
    pool = onehot / jnp.maximum(jnp.sum(onehot, axis=1, keepdims=True), 1.0)
    pooled = pool @ out
    return pooled @ params["lin_w"] + params["lin_b"]


# ----------------------------------- main -------------------------------------

if __name__ == "__main__":
    num_features = 8
    hidden_channels = 8
    num_classes = 3
    heads = HEADS
    n_nodes = 40          # padded to 128 inside gat_forward (one 128-row tile)
    n_edges = 96
    batch_size = 2

    key = jax.random.PRNGKey(0)
    ks = jax.random.split(key, 8)

    x = jax.random.normal(ks[0], (n_nodes, num_features), dtype=jnp.float32)
    edge_index = jax.random.randint(ks[1], (2, n_edges), 0, n_nodes,
                                    dtype=jnp.int32)
    batch = jnp.concatenate([
        jnp.zeros((n_nodes // 2,), jnp.int32),
        jnp.ones((n_nodes - n_nodes // 2,), jnp.int32),
    ])

    hc = heads * hidden_channels
    params = {
        "w": 0.3 * jax.random.normal(ks[2], (num_features, hc), jnp.float32),
        "att_src": 0.3 * jax.random.normal(ks[3], (heads, hidden_channels),
                                           jnp.float32),
        "att_dst": 0.3 * jax.random.normal(ks[4], (heads, hidden_channels),
                                           jnp.float32),
        "bias": 0.1 * jax.random.normal(ks[5], (1, hc), jnp.float32),
        "lin_w": 0.3 * jax.random.normal(ks[6], (hc, num_classes), jnp.float32),
        "lin_b": 0.1 * jax.random.normal(ks[7], (1, num_classes), jnp.float32),
    }

    out = gat_forward(x, edge_index, batch, batch_size, params,
                      heads=heads, hidden=hidden_channels,
                      num_classes=num_classes)
    out = jax.block_until_ready(out)

    ref = gat_reference(x, edge_index, batch, batch_size, params,
                        heads=heads, hidden=hidden_channels)
    assert out.shape == (batch_size, num_classes)
    # bf16 mask / bf16 aggregation matmul + approx reciprocal on all gens.
    rtol = atol = 5e-2
    assert jnp.allclose(out, ref, rtol=rtol, atol=atol), (out, ref)

    print("KERNEL_OK")
</pallas_src>

<mosaic_0001>
module attributes {stable_mosaic.version = 11 : i64} {
  func.func @gat_kernel(%arg0: i32, %arg1: i32, %arg2: memref<4x1x128xbf16, #tpu.memory_space<vmem>>, %arg3: memref<4x128x1xbf16, #tpu.memory_space<vmem>>, %arg4: memref<128x128xbf16, #tpu.memory_space<vmem>>, %arg5: memref<4x128x9xbf16, #tpu.memory_space<vmem>>, %arg6: memref<4x1x8xf32, #tpu.memory_space<vmem>>, %arg7: memref<2x128xf32, #tpu.memory_space<vmem>>, %arg8: memref<1x1x2x8xf32, #tpu.memory_space<vmem>>) attributes {dimension_semantics = [#tpu.dimension_semantics<parallel>, #tpu.dimension_semantics<parallel>], iteration_bounds = array<i64: 1, 4>, scalar_prefetch = 0 : i64, scratch_operands = 0 : i64, tpu.core_type = #tpu.core_type<tc>, window_params = [{pipeline_mode = #tpu.pipeline_mode<synchronous>, transform_indices = @transform_0, window_bounds = array<i64: 4, 1, 128>}, {transform_indices = @transform_1, window_bounds = array<i64: 4, 128, 1>}, {transform_indices = @transform_2, window_bounds = array<i64: 128, 128>}, {pipeline_mode = #tpu.pipeline_mode<synchronous>, transform_indices = @transform_3, window_bounds = array<i64: 4, 128, 9>}, {pipeline_mode = #tpu.pipeline_mode<synchronous>, transform_indices = @transform_4, window_bounds = array<i64: 4, 1, 8>}, {transform_indices = @transform_5, window_bounds = array<i64: 2, 128>}, {transform_indices = @transform_6, window_bounds = array<i64: 1, 1, 2, 8>}]} {
    %0 = arith.index_cast %arg1 : i32 to index
    %c0 = arith.constant 0 : index
    %c0_0 = arith.constant 0 : index
    %1 = vector.load %arg2[%0, %c0, %c0_0] : memref<4x1x128xbf16, #tpu.memory_space<vmem>>, vector<1x1x128xbf16>
    %2 = vector.shape_cast %1 : vector<1x1x128xbf16> to vector<1x128xbf16>
    %3 = arith.index_cast %arg1 : i32 to index
    %c0_1 = arith.constant 0 : index
    %c0_2 = arith.constant 0 : index
    %4 = vector.load %arg3[%3, %c0_1, %c0_2] : memref<4x128x1xbf16, #tpu.memory_space<vmem>>, vector<1x128x1xbf16>
    %5 = vector.shape_cast %4 : vector<1x128x1xbf16> to vector<128x1xbf16>
    %c0_3 = arith.constant 0 : index
    %c0_4 = arith.constant 0 : index
    %6 = vector.load %arg4[%c0_3, %c0_4] : memref<128x128xbf16, #tpu.memory_space<vmem>>, vector<128x128xbf16>
    %7 = vector.broadcast %5 : vector<128x1xbf16> to vector<128x128xbf16>
    %8 = vector.broadcast %2 : vector<1x128xbf16> to vector<128x128xbf16>
    %9 = arith.addf %7, %8 : vector<128x128xbf16>
    %cst = arith.constant 2.001950e-01 : bf16
    %10 = vector.broadcast %cst : bf16 to vector<128x128xbf16>
    %11 = arith.mulf %10, %9 : vector<128x128xbf16>
    %12 = arith.maximumf %9, %11 : vector<128x128xbf16>
    %13 = arith.addf %12, %6 : vector<128x128xbf16>
    %cst_5 = arith.constant dense<0xFF80> : vector<128xbf16>
    %14 = vector.multi_reduction <maximumf>, %13, %cst_5 [1] : vector<128x128xbf16> to vector<128xbf16>
    %15 = vector.shape_cast %14 : vector<128xbf16> to vector<128x1xbf16>
    %16 = vector.broadcast %15 : vector<128x1xbf16> to vector<128x128xbf16>
    %17 = arith.subf %13, %16 : vector<128x128xbf16>
    %18 = math.exp %17 : vector<128x128xbf16>
    %19 = arith.index_cast %arg1 : i32 to index
    %c0_6 = arith.constant 0 : index
    %c0_7 = arith.constant 0 : index
    %20 = vector.load %arg5[%19, %c0_6, %c0_7] : memref<4x128x9xbf16, #tpu.memory_space<vmem>>, vector<1x128x9xbf16>
    %21 = vector.shape_cast %20 : vector<1x128x9xbf16> to vector<128x9xbf16>
    %cst_8 = arith.constant dense<0.000000e+00> : vector<128x9xf32>
    %22 = tpu.matmul %18, %21, %cst_8 {dimension_numbers = #tpu.dot_dimension_numbers<[1], [0], [0], [1], [0, 0, 1, 1], [], []>} : vector<128x128xbf16>, vector<128x9xbf16>, vector<128x9xf32> -> vector<128x9xf32>
    %23 = vector.extract_strided_slice %22 {offsets = [0, 8], sizes = [128, 1], strides = [1, 1]} : vector<128x9xf32> to vector<128x1xf32>
    %24 = tpu.reciprocal %23 {approx = true} : vector<128x1xf32> -> vector<128x1xf32>
    %25 = vector.extract_strided_slice %22 {offsets = [0, 0], sizes = [128, 8], strides = [1, 1]} : vector<128x9xf32> to vector<128x8xf32>
    %26 = vector.broadcast %24 : vector<128x1xf32> to vector<128x8xf32>
    %27 = arith.mulf %25, %26 : vector<128x8xf32>
    %28 = arith.index_cast %arg1 : i32 to index
    %c0_9 = arith.constant 0 : index
    %c0_10 = arith.constant 0 : index
    %29 = vector.load %arg6[%28, %c0_9, %c0_10] : memref<4x1x8xf32, #tpu.memory_space<vmem>>, vector<1x1x8xf32>
    %30 = vector.shape_cast %29 : vector<1x1x8xf32> to vector<1x8xf32>
    %31 = vector.broadcast %30 : vector<1x8xf32> to vector<128x8xf32>
    %32 = arith.addf %27, %31 : vector<128x8xf32>
    %cst_11 = arith.constant 0.00999999977 : f32
    %33 = vector.broadcast %cst_11 : f32 to vector<128x8xf32>
    %34 = arith.mulf %33, %32 : vector<128x8xf32>
    %35 = arith.maximumf %32, %34 : vector<128x8xf32>
    %c0_12 = arith.constant 0 : index
    %c0_13 = arith.constant 0 : index
    %36 = vector.load %arg7[%c0_12, %c0_13] : memref<2x128xf32, #tpu.memory_space<vmem>>, vector<2x128xf32>
    %cst_14 = arith.constant dense<0.000000e+00> : vector<2x8xf32>
    %37 = tpu.matmul %36, %35, %cst_14 {dimension_numbers = #tpu.dot_dimension_numbers<[1], [0], [0], [1], [0, 0, 1, 1], [], []>} : vector<2x128xf32>, vector<128x8xf32>, vector<2x8xf32> -> vector<2x8xf32>
    %38 = vector.shape_cast %37 : vector<2x8xf32> to vector<1x1x2x8xf32>
    %c0_15 = arith.constant 0 : index
    %c0_16 = arith.constant 0 : index
    %c0_17 = arith.constant 0 : index
    %c0_18 = arith.constant 0 : index
    %39 = vector.load %arg8[%c0_15, %c0_16, %c0_17, %c0_18] : memref<1x1x2x8xf32, #tpu.memory_space<vmem>>, vector<1x1x2x8xf32>
    tpu.vector_store %arg8[%c0_15, %c0_16, %c0_17, %c0_18], %38 {strides = array<i32>} : memref<1x1x2x8xf32, #tpu.memory_space<vmem>>, vector<1x1x2x8xf32>,
    return
  }
  func.func @transform_0(%arg0: i32, %arg1: i32) -> (i32, i32, i32) {
    %c0_i32 = arith.constant 0 : i32
    %c0_i32_0 = arith.constant 0 : i32
    %c0_i32_1 = arith.constant 0 : i32
    %c0_i32_2 = arith.constant 0 : i32
    return %c0_i32, %c0_i32_0, %c0_i32_1 : i32, i32, i32
  }
  func.func @transform_1(%arg0: i32, %arg1: i32) -> (i32, i32, i32) {
    %c0_i32 = arith.constant 0 : i32
    %c0_i32_0 = arith.constant 0 : i32
    %c0_i32_1 = arith.constant 0 : i32
    return %c0_i32, %arg0, %c0_i32_0 : i32, i32, i32
  }
  func.func @transform_2(%arg0: i32, %arg1: i32) -> (i32, i32) {
    %c0_i32 = arith.constant 0 : i32
    %c0_i32_0 = arith.constant 0 : i32
    return %arg0, %c0_i32 : i32, i32
  }
  func.func @transform_3(%arg0: i32, %arg1: i32) -> (i32, i32, i32) {
    %c0_i32 = arith.constant 0 : i32
    %c0_i32_0 = arith.constant 0 : i32
    %c0_i32_1 = arith.constant 0 : i32
    %c0_i32_2 = arith.constant 0 : i32
    return %c0_i32, %c0_i32_0, %c0_i32_1 : i32, i32, i32
  }
  func.func @transform_4(%arg0: i32, %arg1: i32) -> (i32, i32, i32) {
    %c0_i32 = arith.constant 0 : i32
    %c0_i32_0 = arith.constant 0 : i32
    %c0_i32_1 = arith.constant 0 : i32
    %c0_i32_2 = arith.constant 0 : i32
    return %c0_i32, %c0_i32_0, %c0_i32_1 : i32, i32, i32
  }
  func.func @transform_5(%arg0: i32, %arg1: i32) -> (i32, i32) {
    %c0_i32 = arith.constant 0 : i32
    %c0_i32_0 = arith.constant 0 : i32
    return %c0_i32, %arg0 : i32, i32
  }
  func.func @transform_6(%arg0: i32, %arg1: i32) -> (i32, i32, i32, i32) {
    %c0_i32 = arith.constant 0 : i32
    %c0_i32_0 = arith.constant 0 : i32
    %c0_i32_1 = arith.constant 0 : i32
    return %arg0, %arg1, %c0_i32, %c0_i32_0 : i32, i32, i32, i32
  }
}

</mosaic_0001>

<bundles_post_ra>
// kernel: tpu_custom_call.1
= control target key start
LH: loop header
LB: loop body
LE: loop exit
PB: predicated region body
PF: predicated region fallthrough
CT: control target
= control target key end

     0   :  { %s2732_s0 = inlined_call_operand.hbm [shape: bf16[4,1,128], index: 0, kind: input, shape index: {}]   ;;  %s2733_s1 = inlined_call_operand.hbm [shape: bf16[4,128,1], index: 1, kind: input, shape index: {}]   ;;  %s2734_s2 = inlined_call_operand.hbm [shape: bf16[128,128], index: 2, kind: input, shape index: {}]   ;;  %s2735_s3 = inlined_call_operand.hbm [shape: bf16[4,128,9], index: 3, kind: input, shape index: {}]   ;;  %s2736_s4 = inlined_call_operand.hbm [shape: f32[4,1,8], index: 4, kind: input, shape index: {}]   ;;  %s2737_s5 = inlined_call_operand.hbm [shape: f32[2,128], index: 5, kind: input, shape index: {}]   ;;  %s2738_s6 = inlined_call_operand.hbm [shape: f32[1,4,2,8], index: 6, kind: output, shape index: {}]  }
   0x1   :  { %2748 = sst [smem:[#allocation22_spill]] %s2733_s1 }
   0x2   :  { %11 = vsyncpa [#allocation3], 0 }
   0x3   :  { %12 = vsyncpa [#allocation6], 0 }
   0x4   :  { %13 = vsyncpa [#allocation9], 0 }
   0x5   :  { %14 = vsyncpa [#allocation12], 0 }
   0x6   :  { %15 = vsyncpa [#allocation4], 0 }
   0x7   :  { %17 = vsyncpa [#allocation4 + $0x1], 0  ;;  %s2218_s21 = smov 0   ;;  %s2220_s22 = smov 0  }
   0x8   :  { %s2222_s23 = smov 0   ;;  %s2224_s24 = smov 0  }
   0x9   :  { %s2226_s25 = smov 0   ;;  %s2228_s26 = smov 0  }
   0xa LB: > { %2749 = sst [smem:[#allocation19_spill]] %s2159_s25  ;;  %s1522_s27 = sadd.s32 4294967295, %s2163_s26   ;;  %s2163_s26 = sphi %s2228_s26, %s23_s26   ;;  %s2159_s25 = sphi %s2226_s25, %s2768_s25   ;;  %s2155_s24 = sphi %s2224_s24, %s2767_s24   ;;  %s2151_s23 = sphi %s2222_s23, %s2771_s23   ;;  %s2147_s22 = sphi %s2220_s22, %s2770_s22   ;;  %s2143_s21 = sphi %s2218_s21, %s2769_s21  }
   0xb   : > { %s1523_s28 = sadd.s32 4294967294, %s2163_s26   ;;  %s32_s29 = sadd.s32 1, %s2159_s25 }
   0xc   : > { %s185_s30 = sadd.s32 1, %s2151_s23  ;;  %p33_p0 = scmp.ge.s32.totalorder %s32_s29, 4 }
   0xd   : > { %p195_p1 = scmp.ne.s32.totalorder %s2151_s23, %s2147_s22  ;;  %p196_p2 = scmp.eq.s32.totalorder %s1522_s27, 3 }
   0xe   : > { %p201_p3 = scmp.ne.s32.totalorder %s2147_s22, %s2143_s21  ;;  %s2773_s29 = smov (%p33_p0, %s32_s29), 0 }
   0xf   : > { %2750 = sst [smem:[#allocation20_spill]] %s2773_s29  ;;  %p2258_p4 = por %p196_p2, %p195_p1 }
  0x10   : > { %p202_p5 = scmp.eq.s32.totalorder %s1523_s28, 3  ;;  %s181_s8 = ssub.s32 %s2159_s25, %s2773_s29 }
  0x11   : > { %s2751_s7 = scalar_select %p2258_p4, 1, 0 }
  0x12   : > { %p1524_p6 = scmp.ge.s32.totalorder %s2163_s26, 1  ;;  %p183_p7 = scmp.eq.s32.totalorder %s181_s8, 0 }
  0x13   : > { %p2265_p8 = por %p202_p5, %p201_p3  ;;  %p209_p9 = scmp.lt.s32.totalorder %s2163_s26, 5 }
  0x14   : > { %s2271_s10 = scalar_select %p183_p7, %s2151_s23, %s185_s30  }
  0x15   : > { %s2752_s9 = scalar_select %p2265_p8, 1, 0 }
  0x16   : > { %2753 = sst [smem:[#allocation21_spill]] %s2271_s10  ;;  %p2273_p10 = pnand %p1524_p6, %p209_p9 }
  0x17   : > { %p2277_p11 = scmp.eq.s32.totalorder %s1522_s27, 0  ;;  %s2165_s13 = smov [#allocation5]  }
  0x18   : > { %s2754_s11 = scalar_select %p2273_p10, 1, 0 }
  0x19   : > { %s2755_s12 = scalar_select %p2277_p11, 1, 0 }
  0x1a   : > { %p1724_p12 = pneg %p2273_p10  ;;  %s237_s14 = sshll.u32 %s2165_s13, 4  ;;  %s238_s14 = int_to_ptr.vmem [resolvable:$true] %s237_s14 }
  0x1b   : > { %s2166_s16 = smov [#allocation8]   ;;  %s2757_s1 = sld [smem:[#allocation22_spill]] }
  0x1c   : > { %p2285_p13 = pnand %p2277_p11, %p1724_p12  ;;  %s266_s17 = sshll.u32 %s2166_s16, 4  ;;  %s2289_s17 = int_to_ptr.vmem [resolvable:$true] %s266_s17 }
  0x1e   : > { %p2299_p1 = pneg %p2285_p13 }
  0x21   : > { %s1901_s20 = scalar_lea.hbm %s2757_s1, 4096 }
  0x22   : > { %p1902_p0 = scmp.ne.s32.totalorder %s2757_s1, %s1901_s20  ;;  %p1908_p5 = scmp.lt.u32.totalorder %s1901_s20, %s2757_s1 }
  0x24   : > { %p1904_p2 = pnand %p2299_p1, %p1902_p0 }
  0x26   : > { %p1905_p3 = pneg %p1904_p2 }
  0x28   : > { %p1910_p6 = pnand %p1908_p5, %p1905_p3 }
  0x2a   : > { %1913 = shalt.err (!%p1910_p6)
}
  0x2b   : > { %s1914_s16 = scalar_lea.vmem %s238_s14, 4096  ;;  %p1922_p8 = scmp.lt.s32.totalorder %s238_s14, %s238_s14 }
  0x2c   : > { %p1915_p7 = scmp.ne.s32.totalorder %s238_s14, %s1914_s16  ;;  %p1923_p4 = scmp.lt.s32.totalorder %s1914_s16, %s1914_s16 }
  0x2e   : > { %p1917_p9 = pnand %p1915_p7, %p2299_p1  ;;  %p1924_p11 = por %p1923_p4, %p1922_p8 }
  0x30   : > { %p1918_p12 = pneg %p1917_p9 }
  0x32   : > { %p1925_p10 = pnand %p1924_p11, %p1918_p12 }
  0x34   : > { %1928 = shalt.err (!%p1925_p10)
}
  0x35   : > { %s2745_s18 = smov 64   ;;  %s2746_s19 = smov 4  }
  0x36   : > { %1730 = dma.hbm_to_vmem [thread:$0]  (!%p2285_p13), %s2757_s1, 4096, %s238_s14, [#allocation6], %s2745_s18, %s2745_s18, %s2746_s19  }
  0x37   : > { %s1929_s13 = scalar_lea.hbm %s2735_s3, 4096 }
  0x38   : > { %p1930_p4 = scmp.ne.s32.totalorder %s2735_s3, %s1929_s13  ;;  %p1936_p11 = scmp.lt.u32.totalorder %s1929_s13, %s2735_s3 }
  0x3a   : > { %p1932_p8 = pnand %p1930_p4, %p2299_p1 }
  0x3c   : > { %p1933_p10 = pneg %p1932_p8 }
  0x3e   : > { %p1938_p0 = pnand %p1936_p11, %p1933_p10 }
  0x40   : > { %1941 = shalt.err (!%p1938_p0)
}
  0x41   : > { %s1942_s14 = scalar_lea.vmem %s2289_s17, 4096  ;;  %p1950_p6 = scmp.lt.s32.totalorder %s2289_s17, %s2289_s17 }
  0x42   : > { %p1943_p2 = scmp.ne.s32.totalorder %s2289_s17, %s1942_s14  ;;  %p1951_p7 = scmp.lt.s32.totalorder %s1942_s14, %s1942_s14 }
  0x44   : > { %p1945_p3 = pnand %p1943_p2, %p2299_p1  ;;  %p1952_p9 = por %p1951_p7, %p1950_p6 }
  0x46   : > { %p1946_p5 = pneg %p1945_p3 }
  0x48   : > { %p1953_p12 = pnand %p1952_p9, %p1946_p5 }
  0x4a   : > { %1956 = shalt.err (!%p1953_p12)
}
  0x4b   : > { %1736 = dma.hbm_to_vmem [thread:$0]  (!%p2285_p13), %s2735_s3, 4096, %s2289_s17, [#allocation9], %s2745_s18, %s2745_s18, %s2746_s19  }
  0x4c   : > { %s2169_s10 = smov [#allocation2]   ;;  %s1957_s8 = scalar_lea.hbm %s2732_s0, 64 }
  0x4d   : > { %s221_s20 = sshll.u32 %s2169_s10, 4  ;;  %p1958_p4 = scmp.ne.s32.totalorder %s2732_s0, %s1957_s8  ;;  %s222_s20 = int_to_ptr.vmem [resolvable:$true] %s221_s20 }
  0x4e   : > { %p1964_p11 = scmp.lt.u32.totalorder %s1957_s8, %s2732_s0 }
  0x4f   : > { %p1960_p8 = pnand %p1958_p4, %p2299_p1 }
  0x51   : > { %p1961_p10 = pneg %p1960_p8 }
  0x53   : > { %p1966_p0 = pnand %p1964_p11, %p1961_p10 }
  0x55   : > { %1969 = shalt.err (!%p1966_p0)
}
  0x56   : > { %s1970_s17 = scalar_lea.vmem %s222_s20, 64  ;;  %p1978_p6 = scmp.lt.s32.totalorder %s222_s20, %s222_s20 }
  0x57   : > { %p1971_p2 = scmp.ne.s32.totalorder %s222_s20, %s1970_s17  ;;  %p1979_p7 = scmp.lt.s32.totalorder %s1970_s17, %s1970_s17 }
  0x59   : > { %p1973_p3 = pnand %p1971_p2, %p2299_p1  ;;  %p1980_p9 = por %p1979_p7, %p1978_p6 }
  0x5b   : > { %p1974_p5 = pneg %p1973_p3 }
  0x5d   : > { %p1981_p12 = pnand %p1980_p9, %p1974_p5 }
  0x5f   : > { %1984 = shalt.err (!%p1981_p12)
}
  0x60   : > { %s2747_s25 = smov 16   ;;  %s2171_s29 = smov 1  }
  0x61   : > { %1727 = dma.hbm_to_vmem [thread:$0]  (!%p2285_p13), %s2732_s0, 64, %s222_s20, [#allocation3], %s2747_s25, %s2747_s25, %s2171_s29  }
  0x62   : > { %s2172_s27 = smov [#allocation7]   ;;  %s2173_s8 = smov [#allocation10]  }
  0x63   : > { %s253_s28 = sshll.u32 %s2172_s27, 4  ;;  %s279_s13 = sshll.u32 %s2173_s8, 4  ;;  %s254_s28 = int_to_ptr.vmem [resolvable:$true] %s253_s28  ;;  %s2365_s13 = int_to_ptr.vmem [resolvable:$true] %s279_s13 }
  0x64   : > { %s1985_s17 = scalar_lea.hbm %s2734_s2, 1024 }
  0x65   : > { %p1986_p4 = scmp.ne.s32.totalorder %s2734_s2, %s1985_s17  ;;  %p1992_p11 = scmp.lt.u32.totalorder %s1985_s17, %s2734_s2 }
  0x67   : > { %p1988_p8 = pnand %p1986_p4, %p2299_p1 }
  0x69   : > { %p1989_p10 = pneg %p1988_p8 }
  0x6b   : > { %p1994_p0 = pnand %p1992_p11, %p1989_p10 }
  0x6d   : > { %1997 = shalt.err (!%p1994_p0)
}
  0x6e   : > { %s1998_s10 = scalar_lea.vmem %s254_s28, 1024  ;;  %p2006_p6 = scmp.lt.s32.totalorder %s254_s28, %s254_s28 }
  0x6f   : > { %p1999_p2 = scmp.ne.s32.totalorder %s254_s28, %s1998_s10  ;;  %p2007_p7 = scmp.lt.s32.totalorder %s1998_s10, %s1998_s10 }
  0x71   : > { %p2001_p3 = pnand %p1999_p2, %p2299_p1  ;;  %p2008_p9 = por %p2007_p7, %p2006_p6 }
  0x73   : > { %p2002_p5 = pneg %p2001_p3 }
  0x75   : > { %p2009_p12 = pnand %p2008_p9, %p2002_p5 }
  0x77   : > { %2012 = shalt.err (!%p2009_p12)
}
  0x78   : > { %s2759_s18 = smov 4   ;;  %s2760_s19 = smov 64  }
  0x79   : > { %1733 = dma.hbm_to_vmem [thread:$0]  (!%p2285_p13), %s2734_s2, 1024, %s254_s28, [#allocation6], %s2760_s19, %s2760_s19, %s2759_s18  }
  0x7a   : > { %s2013_s17 = scalar_lea.hbm %s2736_s4, 64 }
  0x7b   : > { %p2014_p4 = scmp.ne.s32.totalorder %s2736_s4, %s2013_s17  ;;  %p2020_p11 = scmp.lt.u32.totalorder %s2013_s17, %s2736_s4 }
  0x7d   : > { %p2016_p8 = pnand %p2014_p4, %p2299_p1 }
  0x7f   : > { %p2017_p10 = pneg %p2016_p8 }
  0x81   : > { %p2022_p0 = pnand %p2020_p11, %p2017_p10 }
  0x83   : > { %2025 = shalt.err (!%p2022_p0)
}
  0x84   : > { %s2026_s28 = scalar_lea.vmem %s2365_s13, 64  ;;  %p2034_p6 = scmp.lt.s32.totalorder %s2365_s13, %s2365_s13 }
  0x85   : > { %p2027_p2 = scmp.ne.s32.totalorder %s2365_s13, %s2026_s28  ;;  %p2035_p7 = scmp.lt.s32.totalorder %s2026_s28, %s2026_s28 }
  0x87   : > { %p2029_p3 = pnand %p2027_p2, %p2299_p1  ;;  %p2036_p9 = por %p2035_p7, %p2034_p6 }
  0x89   : > { %p2030_p5 = pneg %p2029_p3 }
  0x8b   : > { %p2037_p12 = pnand %p2036_p9, %p2030_p5 }
  0x8d   : > { %2040 = shalt.err (!%p2037_p12)
}
  0x8e   : > { %s2761_s25 = smov 16   ;;  %s2174_s27 = smov [#allocation11]  }
  0x8f   : > { %1739 = dma.hbm_to_vmem [thread:$0]  (!%p2285_p13), %s2736_s4, 64, %s2365_s13, [#allocation9], %s2761_s25, %s2761_s25, %s2171_s29  }
  0x90   : > { %s295_s8 = sshll.u32 %s2174_s27, 4  ;;  %s2041_s17 = scalar_lea.hbm %s2737_s5, 32  ;;  %s296_s8 = int_to_ptr.vmem [resolvable:$true] %s295_s8 }
  0x91   : > { %p2042_p4 = scmp.ne.s32.totalorder %s2737_s5, %s2041_s17  ;;  %p2048_p11 = scmp.lt.u32.totalorder %s2041_s17, %s2737_s5 }
  0x93   : > { %p2044_p8 = pnand %p2042_p4, %p2299_p1 }
  0x95   : > { %p2045_p10 = pneg %p2044_p8 }
  0x97   : > { %p2050_p0 = pnand %p2048_p11, %p2045_p10 }
  0x99   : > { %2053 = shalt.err (!%p2050_p0)
}
  0x9a   : > { %s2054_s29 = scalar_lea.vmem %s296_s8, 32  ;;  %p2062_p6 = scmp.lt.s32.totalorder %s296_s8, %s296_s8 }
  0x9b   : > { %p2055_p2 = scmp.ne.s32.totalorder %s296_s8, %s2054_s29  ;;  %p2063_p7 = scmp.lt.s32.totalorder %s2054_s29, %s2054_s29 }
  0x9d   : > { %p2057_p3 = pnand %p2055_p2, %p2299_p1  ;;  %p2064_p9 = por %p2063_p7, %p2062_p6 }
  0x9f   : > { %p2058_p5 = pneg %p2057_p3 }
  0xa1   : > { %p2065_p12 = pnand %p2064_p9, %p2058_p5 }
  0xa3   : > { %2068 = shalt.err (!%p2065_p12)
}
  0xa4   : > { %1742 = dma.hbm_to_vmem [thread:$0]  (!%p2285_p13), %s2737_s5, 32, %s296_s8, [#allocation12]  }
  0xa5   : > { %p2762_p4 = scmp.ne.s32.totalorder %s2754_s11, 0 }
  0xa6   : > { %p2763_p8 = scmp.ne.s32.totalorder (!%p2762_p4), %s2755_s12, 0 }
  0xa7   : > { %308 = sbr.rel (%p2762_p4) target bundleno = 1129 (0x469), region = 44 }
  0xae   : > { %2122 = dma.done.wait (%p2763_p8), [#allocation3], 64  }
  0xaf   : > { %2124 = vsyncadd (%p2763_p8), [#allocation3], 4294967232 }
  0xb0   : > { %2126 = dma.done.wait (%p2763_p8), [#allocation6], 5120  }
  0xb1   : > { %2128 = vsyncadd (%p2763_p8), [#allocation6], 4294962176 }
  0xb2   : > { %2130 = dma.done.wait (%p2763_p8), [#allocation9], 4160  }
  0xb3   : > { %2132 = vsyncadd (%p2763_p8), [#allocation9], 4294963136 }
  0xb4   : > { %2134 = dma.done.wait (%p2763_p8), [#allocation12], 32  }
  0xb5   : > { %2136 = vsyncadd (%p2763_p8), [#allocation12], 4294967264  ;;  %v2175_v0 = vmov 0   ;;  %s1572_s11 = sshll.u32 %s2155_s24, 6  ;;  %v402_v20 = vlaneseq  ;;  %s357_s30 = scalar_lea.vmem [#allocation2], %s2155_s24  ;;  %vm2180_vm0 = vmmov 0  }
  0xb6   : > { %1826 = vset.pattern.permute.xlu1 %v2175_v0  ;;  %1825 = vset.pattern.permute.xlu0 %v2175_v0  ;;  %s361_s15 = scalar_lea.vmem [#allocation5], %s1572_s11  ;;  %s2455_s12 = scalar_lea.vmem [#allocation8], %s1572_s11  ;;  %v358_v22 = vld [vmem:[%s357_s30] sm:$0x1]  ;;  %v2176_v23 = vmov 839922192  }
  0xb7   : > { %v364_v1 = vld [vmem:[%s361_s15 + $0x8] sm:$0xf]  ;;  %v362_v2 = vld [vmem:[%s361_s15] sm:$0xf]  ;;  %v365_v3 = vld [vmem:[%s361_s15 + $0xc] sm:$0xf]  ;;  %v400_v24 = vunpack.c.l.s4 %v2176_v23  ;;  %v587_v26 = vpack.i.b16 %v358_v22, %v358_v22 }
  0xb8   : > { %420 = vperm.xlu1 %1826, %v364_v1   ;;  %396 = vperm.xlu0 %1825, %v362_v2   ;;  %v363_v4 = vld [vmem:[%s361_s15 + $0x4] sm:$0xf]  ;;  %v367_v5 = vld [vmem:[%s361_s15 + $0x14] sm:$0xf]  ;;  %v366_v6 = vld [vmem:[%s361_s15 + $0x10] sm:$0xf] }
  0xb9   : > { %v369_v7 = vld [vmem:[%s361_s15 + $0x1c] sm:$0xf]  ;;  %v368_v8 = vld [vmem:[%s361_s15 + $0x18] sm:$0xf]  ;;  %v371_v9 = vld [vmem:[%s361_s15 + $0x24] sm:$0xf]  ;;  %v401_v27 = vunpack.c.0.s8 %v400_v24 }
  0xba   : > { %v370_v10 = vld [vmem:[%s361_s15 + $0x20] sm:$0xf]  ;;  %v373_v11 = vld [vmem:[%s361_s15 + $0x2c] sm:$0xf]  ;;  %v372_v12 = vld [vmem:[%s361_s15 + $0x28] sm:$0xf] }
  0xbb   : > { %v375_v13 = vld [vmem:[%s361_s15 + $0x34] sm:$0xf]  ;;  %v374_v14 = vld [vmem:[%s361_s15 + $0x30] sm:$0xf]  ;;  %v377_v15 = vld [vmem:[%s361_s15 + $0x3c] sm:$0xf] }
  0xbc   : > { %432 = vperm.xlu1 %1826, %v365_v3   ;;  %408 = vperm.xlu0 %1825, %v363_v4   ;;  %v376_v16 = vld [vmem:[%s361_s15 + $0x38] sm:$0xf]  ;;  %v1829_v17 = vld [vmem:[%s2455_s12] sm:$0xff]   ;;  %v1830_v18 = vld [vmem:[%s2455_s12 + $0x8] sm:$0xff]   ;;  %v2460_v21 = vshrl.u32 %v402_v20, 7  ;;  %s1248_s18 = scalar_lea.vmem [#allocation10], %s2155_s24 }
  0xbd   : > { %1607 = vmatprep.subr.bf16.mxu0 %v1829_v17  ;;  %v1831_v19 = vld [vmem:[%s2455_s12 + $0x10] sm:$0xff]   ;;  %v380_v53 = vld [vmem:[#allocation7 + $0x8] sm:$0xf]  ;;  %v378_v59 = vld [vmem:[#allocation7] sm:$0xf]  ;;  %s350_s19 = sand.u32 1, %s2147_s22  }
  0xbe   : > { %1608 = vmatpush3.bf16.msra.mxu0 %v1829_v17  ;;  %v591_v25 = vsub.s32 0, %v2460_v21  ;;  %v2465_v29 = vsub.s32 %v401_v27, %v2460_v21  ;;  %v381_v58 = vld [vmem:[#allocation7 + $0xc] sm:$0xf]  ;;  %v379_v60 = vld [vmem:[#allocation7 + $0x4] sm:$0xf]  ;;  %s1538_s27 = sshll.u32 %s350_s19, 1 }
  0xbf   : > { %1609 = vmatprep.subr.bf16.mxu0 %v1830_v18  ;;  %v383_v20 = vld [vmem:[#allocation7 + $0x14] sm:$0xf]  ;;  %v385_v27 = vld [vmem:[#allocation7 + $0x1c] sm:$0xf]  ;;  %s1569_s8 = sshll.u32 %s2155_s24, 5  ;;  %s352_s16 = scalar_lea.vmem [#allocation13], %s1538_s27 }
  0xc0   : > { %456 = vperm.xlu1 %1826, %v367_v5   ;;  %444 = vperm.xlu0 %1825, %v366_v6   ;;  %v592_v28 = vrot.slane %v587_v26, %v591_v25  ;;  %v384_v26 = vld [vmem:[#allocation7 + $0x18] sm:$0xf]  ;;  %s1393_s14 = sshll.u32 %s352_s16, 4  ;;  %vm1375_vm1 = vcmask 58368   ;;  %s2685_s20 = scalar_lea.hbm %s2738_s6, %s1569_s8  ;;  %s2687_s14 = int_to_ptr.vmem [resolvable:$true] %s1393_s14 }
  0xc1   : > { %s1378_s10 = scalar_lea.sflag [#allocation4], %s350_s19  ;;  %s2069_s28 = scalar_lea.vmem %s2687_s14, 32 }
  0xc2   : > { %1610 = vmatpush3.bf16.msra.mxu0 %v1830_v18  ;;  %v2467_v30 = vcombine.low %v592_v28, %v592_v28  ;;  %p2070_p13 = scmp.ne.s32.totalorder %s2687_s14, %s2069_s28  ;;  %p2764_p1 = scmp.ne.s32.totalorder %s2751_s7, 0 }
  0xc3   : > { %1611 = vmatprep.subr.bf16.mxu0 %v1831_v19  ;;  %s2182_s24 = smov [#allocation13]  }
  0xc4   : > { %480 = vperm.xlu1 %1826, %v369_v7   ;;  %468 = vperm.xlu0 %1825, %v368_v8   ;;  %p2071_p10 = pnand %p2070_p13, %p2764_p1  ;;  %s2073_s29 = sshll.u32 %s2182_s24, 4  ;;  %s2074_s29 = int_to_ptr.vmem [resolvable:$false] %s2073_s29 }
  0xc5   : > { %s2075_s13 = scalar_lea.vmem %s2074_s29, 64  ;;  %p2076_p0 = scmp.lt.s32.totalorder %s2687_s14, %s2074_s29 }
  0xc6   : > { %1612 = vmatpush3.bf16.msra.mxu0 %v1831_v19  ;;  %p2072_p11 = pneg %p2071_p10  ;;  %p2077_p2 = scmp.lt.s32.totalorder %s2075_s13, %s2069_s28 }
  0xc8   : > { %504 = vperm.xlu1 %1826, %v371_v9   ;;  %492 = vperm.xlu0 %1825, %v370_v10   ;;  %p2078_p3 = por %p2077_p2, %p2076_p0 }
  0xca   : > { %p2079_p5 = pnand %p2078_p3, %p2072_p11 }
  0xcc   : > { %528 = vperm.xlu1 %1826, %v373_v11   ;;  %516 = vperm.xlu0 %1825, %v372_v12  }
  0xd0   : > { %552 = vperm.xlu1 %1826, %v375_v13   ;;  %540 = vperm.xlu0 %1825, %v374_v14  }
  0xd4   : > { %576 = vperm.xlu1 %1826, %v377_v15   ;;  %564 = vperm.xlu0 %1825, %v376_v16   ;;  %v382_v15 = vld [vmem:[#allocation7 + $0x10] sm:$0xf] }
 0x137   : > { %v421_v31 = vpop.permute.xlu1 %420  ;;  %v397_v32 = vpop.permute.xlu0 %396 }
 0x138   : > { %v429_v33 = vrot.slane %v421_v31, %v2465_v29  ;;  %v405_v34 = vrot.slane %v397_v32, %v2465_v29 }
 0x13a   : > { %v599_v35 = vadd.bf16 %v2467_v30, %v429_v33  ;;  %v597_v36 = vadd.bf16 %v2467_v30, %v405_v34 }
 0x13b   : > { %v433_v37 = vpop.permute.xlu1 %432  ;;  %v409_v38 = vpop.permute.xlu0 %408 }
 0x13c   : > { %v441_v39 = vrot.slane %v433_v37, %v2465_v29  ;;  %v417_v40 = vrot.slane %v409_v38, %v2465_v29  ;;  %v615_v41 = vmul.bf16 1045249613, %v599_v35  ;;  %v613_v42 = vmul.bf16 1045249613, %v597_v36 }
 0x13e   : > { %v600_v43 = vadd.bf16 %v2467_v30, %v441_v39  ;;  %v598_v44 = vadd.bf16 %v2467_v30, %v417_v40  ;;  %v631_v51 = vmax.bf16 %v615_v41, %v599_v35  ;;  %v629_v52 = vmax.bf16 %v613_v42, %v597_v36 }
 0x13f   : > { %v457_v45 = vpop.permute.xlu1 %456  ;;  %v445_v46 = vpop.permute.xlu0 %444 }
 0x140   : > { %v616_v47 = vmul.bf16 1045249613, %v600_v43  ;;  %v614_v48 = vmul.bf16 1045249613, %v598_v44  ;;  %v465_v49 = vrot.slane %v457_v45, %v2465_v29  ;;  %v453_v50 = vrot.slane %v445_v46, %v2465_v29 }
 0x141   : > { %v2483_v3 = vadd.bf16 %v631_v51, %v380_v53  ;;  %v2487_v5 = vadd.bf16 %v629_v52, %v378_v59  ;;  %v387_v53 = vld [vmem:[#allocation7 + $0x24] sm:$0xf]  ;;  %v389_v59 = vld [vmem:[#allocation7 + $0x2c] sm:$0xf] }
 0x142   : > { %v632_v54 = vmax.bf16 %v616_v47, %v600_v43  ;;  %v630_v55 = vmax.bf16 %v614_v48, %v598_v44  ;;  %v602_v56 = vadd.bf16 %v2467_v30, %v465_v49  ;;  %v601_v57 = vadd.bf16 %v2467_v30, %v453_v50  ;;  %v386_v48 = vld [vmem:[#allocation7 + $0x20] sm:$0xf] }
 0x143   : > { %v481_v61 = vpop.permute.xlu1 %480  ;;  %v469_v62 = vpop.permute.xlu0 %468 }
 0x144   : > { %v618_v63 = vmul.bf16 1045249613, %v602_v56  ;;  %v617_v0 = vmul.bf16 1045249613, %v601_v57  ;;  %v489_v1 = vrot.slane %v481_v61, %v2465_v29  ;;  %v477_v2 = vrot.slane %v469_v62, %v2465_v29 }
 0x145   : > { %v2485_v4 = vadd.bf16 %v632_v54, %v381_v58  ;;  %v2489_v6 = vadd.bf16 %v630_v55, %v379_v60  ;;  %v388_v58 = vld [vmem:[#allocation7 + $0x28] sm:$0xf] }
 0x146   : > { %v604_v7 = vadd.bf16 %v2467_v30, %v489_v1  ;;  %v603_v8 = vadd.bf16 %v2467_v30, %v477_v2  ;;  %v634_v9 = vmax.bf16 %v618_v63, %v602_v56  ;;  %v633_v10 = vmax.bf16 %v617_v0, %v601_v57 }
 0x147   : > { %v505_v11 = vpop.permute.xlu1 %504  ;;  %v493_v12 = vpop.permute.xlu0 %492  ;;  %v1543_v13 = vcombine.low %v2483_v3, %v2485_v4  ;;  %v1542_v14 = vcombine.low %v2487_v5, %v2489_v6 }
 0x148   : > { %v620_v16 = vmul.bf16 1045249613, %v604_v7  ;;  %v619_v17 = vmul.bf16 1045249613, %v603_v8  ;;  %v513_v18 = vrot.slane %v505_v11, %v2465_v29  ;;  %v501_v19 = vrot.slane %v493_v12, %v2465_v29 }
 0x149   : > { %711 = vmax.xlane.bf16.xlu1 %v1543_v13  ;;  %709 = vmax.xlane.bf16.xlu0 %v1542_v14  ;;  %v2501_v32 = vadd.bf16 %v633_v10, %v382_v15  ;;  %v2503_v33 = vadd.bf16 %v634_v9, %v383_v20  ;;  %v392_v20 = vld [vmem:[#allocation7 + $0x38] sm:$0xf] }
 0x14a   : > { %v636_v22 = vmax.bf16 %v620_v16, %v604_v7  ;;  %v635_v23 = vmax.bf16 %v619_v17, %v603_v8  ;;  %v606_v24 = vadd.bf16 %v2467_v30, %v513_v18  ;;  %v605_v25 = vadd.bf16 %v2467_v30, %v501_v19  ;;  %v390_v16 = vld [vmem:[#allocation7 + $0x30] sm:$0xf]  ;;  %v391_v19 = vld [vmem:[#allocation7 + $0x34] sm:$0xf] }
 0x14b   : > { %v529_v28 = vpop.permute.xlu1 %528  ;;  %v517_v31 = vpop.permute.xlu0 %516  ;;  %v1544_v47 = vcombine.low %v2501_v32, %v2503_v33 }
 0x14c   : > { %v622_v34 = vmul.bf16 1045249613, %v606_v24  ;;  %v621_v35 = vmul.bf16 1045249613, %v605_v25  ;;  %v537_v36 = vrot.slane %v529_v28, %v2465_v29  ;;  %v525_v37 = vrot.slane %v517_v31, %v2465_v29  ;;  %v1832_v28 = vld [vmem:[%s2455_s12 + $0x18] sm:$0xff]  }
 0x14d   : > { %v2507_v38 = vadd.bf16 %v635_v23, %v384_v26  ;;  %v2509_v39 = vadd.bf16 %v636_v22, %v385_v27  ;;  %v393_v22 = vld [vmem:[#allocation7 + $0x3c] sm:$0xf]  ;;  %1613 = vmatprep.subr.bf16.mxu0 %v1832_v28 }
 0x14e   : > { %v608_v40 = vadd.bf16 %v2467_v30, %v537_v36  ;;  %v607_v41 = vadd.bf16 %v2467_v30, %v525_v37  ;;  %v638_v42 = vmax.bf16 %v622_v34, %v606_v24  ;;  %v637_v43 = vmax.bf16 %v621_v35, %v605_v25  ;;  %1614 = vmatpush3.bf16.msra.mxu0 %v1832_v28  ;;  %v1833_v35 = vld [vmem:[%s2455_s12 + $0x20] sm:$0xff]   ;;  %v1834_v36 = vld [vmem:[%s2455_s12 + $0x28] sm:$0xff]   ;;  %v1835_v37 = vld [vmem:[%s2455_s12 + $0x30] sm:$0xff]  }
 0x14f   : > { %v553_v44 = vpop.permute.xlu1 %552  ;;  %v541_v45 = vpop.permute.xlu0 %540  ;;  %v1545_v46 = vcombine.low %v2507_v38, %v2509_v39  ;;  %1615 = vmatprep.subr.bf16.mxu0 %v1833_v35 }
 0x150   : > { %v624_v49 = vmul.bf16 1045249613, %v608_v40  ;;  %v623_v50 = vmul.bf16 1045249613, %v607_v41  ;;  %v561_v51 = vrot.slane %v553_v44, %v2465_v29  ;;  %v549_v52 = vrot.slane %v541_v45, %v2465_v29 }
 0x151   : > { %715 = vmax.xlane.bf16.xlu1 %v1545_v46  ;;  %713 = vmax.xlane.bf16.xlu0 %v1544_v47  ;;  %v2521_v62 = vadd.bf16 %v637_v43, %v386_v48  ;;  %v2523_v63 = vadd.bf16 %v638_v42, %v387_v53 }
 0x152   : > { %v640_v54 = vmax.bf16 %v624_v49, %v608_v40  ;;  %v639_v55 = vmax.bf16 %v623_v50, %v607_v41  ;;  %v610_v56 = vadd.bf16 %v2467_v30, %v561_v51  ;;  %v609_v57 = vadd.bf16 %v2467_v30, %v549_v52  ;;  %1616 = vmatpush3.bf16.msra.mxu0 %v1833_v35  ;;  %v1836_v40 = vld [vmem:[%s2455_s12 + $0x38] sm:$0xff]  }
 0x153   : > { %v577_v60 = vpop.permute.xlu1 %576  ;;  %v565_v61 = vpop.permute.xlu0 %564  ;;  %v1546_v15 = vcombine.low %v2521_v62, %v2523_v63  ;;  %1617 = vmatprep.subr.bf16.mxu0 %v1834_v36  ;;  %v2177_v41 = vmov 1985246804  }
 0x154   : > { %v626_v0 = vmul.bf16 1045249613, %v610_v56  ;;  %v625_v1 = vmul.bf16 1045249613, %v609_v57  ;;  %v585_v2 = vrot.slane %v577_v60, %v2465_v29  ;;  %v573_v7 = vrot.slane %v565_v61, %v2465_v29 }
 0x155   : > { %v2527_v8 = vadd.bf16 %v639_v55, %v388_v58  ;;  %v2529_v9 = vadd.bf16 %v640_v54, %v389_v59  ;;  %v741_v42 = vunpack.c.l.s4 %v2177_v41 }
 0x156   : > { %v612_v10 = vadd.bf16 %v2467_v30, %v585_v2  ;;  %v611_v11 = vadd.bf16 %v2467_v30, %v573_v7  ;;  %v642_v12 = vmax.bf16 %v626_v0, %v610_v56  ;;  %v641_v13 = vmax.bf16 %v625_v1, %v609_v57  ;;  %1618 = vmatpush3.bf16.msra.mxu0 %v1834_v36 }
 0x157   : > { %v1547_v14 = vcombine.low %v2527_v8, %v2529_v9  ;;  %1619 = vmatprep.subr.bf16.mxu0 %v1835_v37  ;;  %v742_v43 = vunpack.c.0.s8 %v741_v42 }
 0x158   : > { %v628_v17 = vmul.bf16 1045249613, %v612_v10  ;;  %v627_v18 = vmul.bf16 1045249613, %v611_v11  ;;  %v2537_v24 = vadd.bf16 %v641_v13, %v390_v16  ;;  %v2539_v25 = vadd.bf16 %v642_v12, %v391_v19 }
 0x159   : > { %719 = vmax.xlane.bf16.xlu1 %v1547_v14  ;;  %717 = vmax.xlane.bf16.xlu0 %v1546_v15  ;;  %v2555_v44 = vsub.s32 %v742_v43, %v2460_v21 }
 0x15a   : > { %v644_v23 = vmax.bf16 %v628_v17, %v612_v10  ;;  %v643_v30 = vmax.bf16 %v627_v18, %v611_v11  ;;  %v1548_v34 = vcombine.low %v2537_v24, %v2539_v25  ;;  %1620 = vmatpush3.bf16.msra.mxu0 %v1835_v37 }
 0x15b   : > { %1621 = vmatprep.subr.bf16.mxu0 %v1836_v40 }
 0x15c   : > { %v2541_v26 = vadd.bf16 %v643_v30, %v392_v20  ;;  %v2543_v27 = vadd.bf16 %v644_v23, %v393_v22 }
 0x15e   : > { %v1549_v31 = vcombine.low %v2541_v26, %v2543_v27  ;;  %1622 = vmatpush3.bf16.msra.mxu0 %v1836_v40 }
 0x161   : > { %723 = vmax.xlane.bf16.xlu1 %v1549_v31  ;;  %721 = vmax.xlane.bf16.xlu0 %v1548_v34 }
 0x1da   : > { %v712_v45 = vpop.xlane.xlu1 %711  ;;  %v710_v46 = vpop.xlane.xlu0 %709 }
 0x1db   : > { %v753_v47 = vrot.slane %v712_v45, %v2465_v29  ;;  %v760_v48 = vrot.slane %v712_v45, %v2555_v44  ;;  %v739_v49 = vrot.slane %v710_v46, %v2465_v29  ;;  %v746_v50 = vrot.slane %v710_v46, %v2555_v44 }
 0x1dd   : > { %v863_v51 = vsub.bf16 %v2483_v3, %v753_v47  ;;  %v864_v52 = vsub.bf16 %v2485_v4, %v760_v48  ;;  %v861_v53 = vsub.bf16 %v2487_v5, %v739_v49  ;;  %v862_v54 = vsub.bf16 %v2489_v6, %v746_v50 }
 0x1df   : > { %v884_v21 = vmul.bf16 1069105081, %v863_v51  ;;  %v887_v55 = vmul.bf16 1069105081, %v864_v52  ;;  %v878_v56 = vmul.bf16 1069105081, %v861_v53 }
 0x1e0   : > { %v881_v57 = vmul.bf16 1069105081, %v862_v54 }
 0x1e1   : > { %1837 = vpow.bf16 %v884_v21 }
 0x1e2   : > { %1839 = vpow.bf16 %v887_v55  ;;  %v716_v58 = vpop.xlane.xlu1 %715  ;;  %v714_v59 = vpop.xlane.xlu0 %713 }
 0x1e3   : > { %1841 = vpow.bf16 %v878_v56  ;;  %v781_v60 = vrot.slane %v716_v58, %v2465_v29  ;;  %v788_v61 = vrot.slane %v716_v58, %v2555_v44  ;;  %v767_v3 = vrot.slane %v714_v59, %v2465_v29 }
 0x1e4   : > { %1843 = vpow.bf16 %v881_v57  ;;  %v774_v4 = vrot.slane %v714_v59, %v2555_v44 }
 0x1e5   : > { %v867_v5 = vsub.bf16 %v2507_v38, %v781_v60  ;;  %v868_v6 = vsub.bf16 %v2509_v39, %v788_v61  ;;  %v865_v0 = vsub.bf16 %v2501_v32, %v767_v3  ;;  %v2178_v60 = vmov 8  }
 0x1e6   : > { %v866_v1 = vsub.bf16 %v2503_v33, %v774_v4  ;;  %1828 = vset.pattern.permute.xlu1 %v2178_v60  ;;  %1827 = vset.pattern.permute.xlu0 %v2178_v60 }
 0x1e7   : > { %v896_v2 = vmul.bf16 1069105081, %v867_v5  ;;  %v899_v7 = vmul.bf16 1069105081, %v868_v6  ;;  %v890_v10 = vmul.bf16 1069105081, %v865_v0 }
 0x1e8   : > { %v893_v11 = vmul.bf16 1069105081, %v866_v1 }
 0x1e9   : > { %1845 = vpow.bf16 %v896_v2 }
 0x1ea   : > { %1847 = vpow.bf16 %v899_v7  ;;  %v720_v12 = vpop.xlane.xlu1 %719  ;;  %v718_v13 = vpop.xlane.xlu0 %717 }
 0x1eb   : > { %1849 = vpow.bf16 %v890_v10  ;;  %v809_v14 = vrot.slane %v720_v12, %v2465_v29  ;;  %v816_v15 = vrot.slane %v720_v12, %v2555_v44  ;;  %v795_v38 = vrot.slane %v718_v13, %v2465_v29 }
 0x1ec   : > { %v1838_v39 = vpop.eup %1837  ;;  %1851 = vpow.bf16 %v893_v11  ;;  %v802_v32 = vrot.slane %v718_v13, %v2555_v44 }
 0x1ed   : > { %v1840_v33 = vpop.eup %1839  ;;  %v871_v16 = vsub.bf16 %v2527_v8, %v809_v14  ;;  %v872_v17 = vsub.bf16 %v2529_v9, %v816_v15  ;;  %v869_v18 = vsub.bf16 %v2521_v62, %v795_v38 }
 0x1ee   : > { %v1842_v19 = vpop.eup %1841  ;;  %v870_v20 = vsub.bf16 %v2523_v63, %v802_v32  ;;  %v1552_v31 = vcombine.low %v1838_v39, %v1840_v33 }
 0x1ef   : > { %v1844_v22 = vpop.eup %1843  ;;  %v908_v23 = vmul.bf16 1069105081, %v871_v16  ;;  %v911_v30 = vmul.bf16 1069105081, %v872_v17  ;;  %v902_v28 = vmul.bf16 1069105081, %v869_v18 }
 0x1f0   : > { %v905_v34 = vmul.bf16 1069105081, %v870_v20  ;;  %v1551_v35 = vcombine.low %v1842_v19, %v1844_v22  ;;  %v2179_v19 = vmov 0.0|0.0  }
 0x1f1   : > { %1853 = vpow.bf16 %v908_v23  ;;  %1674 = vmatprep.subr.bf16.mxu1 %v2179_v19 }
 0x1f2   : > { %1855 = vpow.bf16 %v911_v30  ;;  %1623 = vmatprep.mubr.bf16.mxu0 %v1551_v35  ;;  %v724_v36 = vpop.xlane.xlu1 %723  ;;  %v722_v37 = vpop.xlane.xlu0 %721 }
 0x1f3   : > { %1857 = vpow.bf16 %v902_v28  ;;  %1624 = vmatmul.mubr.bf16.vlgmr.msra.gmra.mrb[0].mxu0 %v1552_v31  ;;  %v837_v8 = vrot.slane %v724_v36, %v2465_v29  ;;  %v844_v62 = vrot.slane %v724_v36, %v2555_v44  ;;  %v823_v63 = vrot.slane %v722_v37, %v2465_v29 }
 0x1f4   : > { %v1846_v9 = vpop.eup %1845  ;;  %1859 = vpow.bf16 %v905_v34  ;;  %v830_v40 = vrot.slane %v722_v37, %v2555_v44 }
 0x1f5   : > { %v1848_v41 = vpop.eup %1847  ;;  %v875_v42 = vsub.bf16 %v2541_v26, %v837_v8  ;;  %v876_v43 = vsub.bf16 %v2543_v27, %v844_v62  ;;  %v873_v45 = vsub.bf16 %v2537_v24, %v823_v63  ;;  %v2181_v8 = vmov 0.0   ;;  %v2639_v62 = vld [vmem:[%s1248_s18] ss:$0 sm:$0xff] }
 0x1f6   : > { %v1850_v46 = vpop.eup %1849  ;;  %v874_v47 = vsub.bf16 %v2539_v25, %v830_v40  ;;  %v1554_v52 = vcombine.low %v1846_v9, %v1848_v41  ;;  %1671 = vmatprep.mubr.msk.f32.mxu1 %vm2180_vm0, %v2181_v8 }
 0x1f7   : > { %v1852_v48 = vpop.eup %1851  ;;  %v920_v49 = vmul.bf16 1069105081, %v875_v42  ;;  %v923_v50 = vmul.bf16 1069105081, %v876_v43  ;;  %v914_v51 = vmul.bf16 1069105081, %v873_v45 }
 0x1f8   : > { %v917_v29 = vmul.bf16 1069105081, %v874_v47  ;;  %v1553_v53 = vcombine.low %v1850_v46, %v1852_v48 }
 0x1f9   : > { %1861 = vpow.bf16 %v920_v49 }
 0x1fa   : > { %1863 = vpow.bf16 %v923_v50  ;;  %1627 = vmatprep.mubr.bf16.mxu0 %v1553_v53 }
 0x1fb   : > { %1865 = vpow.bf16 %v914_v51  ;;  %1628 = vmatmul.mubr.bf16.gmra.mrb[4].mxu0 %v1554_v52 }
 0x1fc   : > { %v1854_v26 = vpop.eup %1853  ;;  %1867 = vpow.bf16 %v917_v29 }
 0x1fd   : > { %v1856_v27 = vpop.eup %1855 }
 0x1fe   : > { %v1858_v44 = vpop.eup %1857  ;;  %v1556_v54 = vcombine.low %v1854_v26, %v1856_v27 }
 0x1ff   : > { %v1860_v24 = vpop.eup %1859 }
 0x200   : > { %v1555_v21 = vcombine.low %v1858_v44, %v1860_v24 }
 0x202   : > { %1631 = vmatprep.mubr.bf16.mxu0 %v1555_v21 }
 0x203   : > { %1632 = vmatmul.mubr.bf16.gmra.mrb[8].mxu0 %v1556_v54 }
 0x204   : > { %v1862_v25 = vpop.eup %1861 }
 0x205   : > { %v1864_v55 = vpop.eup %1863 }
 0x206   : > { %v1866_v56 = vpop.eup %1865  ;;  %v1558_v58 = vcombine.low %v1862_v25, %v1864_v55 }
 0x207   : > { %v1868_v57 = vpop.eup %1867 }
 0x208   : > { %v1557_v59 = vcombine.low %v1866_v56, %v1868_v57 }
 0x20a   : > { %1635 = vmatprep.mubr.bf16.mxu0 %v1557_v59 }
 0x20b   : > { %1636 = vmatmul.mubr.bf16.gmra.mrb[12].mxu0 %v1558_v58 }
 0x2c6   : > { %v2589_v61 = vpop.f32.mrb[0].mxu0 }
 0x2c7   : > { %1869 = vrcp.f32 %v2589_v61  ;;  %v2592_v3 = vpop.f32.mrb[1].mxu0 }
 0x2c8   : > { %1871 = vrcp.f32 %v2592_v3  ;;  %v2595_v4 = vpop.f32.mrb[2].mxu0 }
 0x2c9   : > { %v2597_v5 = vpop.f32.mrb[3].mxu0  ;;  %1873 = vrcp.f32 %v2595_v4 }
 0x2ca   : > { %1875 = vrcp.f32 %v2597_v5 }
 0x2ce   : > { %v2600_v6 = vpop.f32.mrb[4].mxu0 }
 0x2cf   : > { %v2603_v0 = vpop.f32.mrb[5].mxu0  ;;  %1877 = vrcp.f32 %v2600_v6 }
 0x2d0   : > { %v2605_v1 = vpop.f32.mrb[6].mxu0  ;;  %1879 = vrcp.f32 %v2603_v0 }
 0x2d1   : > { %v1870_v2 = vpop.eup %1869  ;;  %v2607_v7 = vpop.f32.mrb[7].mxu0 }
 0x2d2   : > { %v1872_v10 = vpop.eup %1871  ;;  %1164 = vperm.xlu1 %1828, %v1870_v2  }
 0x2d3   : > { %1154 = vperm.xlu0 %1827, %v1872_v10   ;;  %v1874_v11 = vpop.eup %1873 }
 0x2d4   : > { %v1876_v15 = vpop.eup %1875 }
 0x2d6   : > { %1169 = vperm.xlu1 %1828, %v1874_v11   ;;  %v2610_v12 = vpop.f32.mrb[8].mxu0 }
 0x2d7   : > { %v2613_v13 = vpop.f32.mrb[9].mxu0 }
 0x2d8   : > { %v2615_v14 = vpop.f32.mrb[10].mxu0 }
 0x2d9   : > { %v2617_v38 = vpop.f32.mrb[11].mxu0  ;;  %v1878_v39 = vpop.eup %1877 }
 0x2da   : > { %1881 = vrcp.f32 %v2617_v38  ;;  %1159 = vperm.xlu1 %1828, %v1876_v15   ;;  %v1880_v17 = vpop.eup %1879 }
 0x2db   : > { %1883 = vrcp.f32 %v2607_v7 }
 0x2dc   : > { %1885 = vrcp.f32 %v2615_v14 }
 0x2dd   : > { %1887 = vrcp.f32 %v2605_v1 }
 0x2de   : > { %1184 = vperm.xlu1 %1828, %v1878_v39   ;;  %v2622_v32 = vpop.f32.mrb[12].mxu0 }
 0x2df   : > { %v2625_v33 = vpop.f32.mrb[13].mxu0 }
 0x2e0   : > { %v2627_v16 = vpop.f32.mrb[14].mxu0 }
 0x2e1   : > { %v2629_v18 = vpop.f32.mrb[15].mxu0 }
 0x2e2   : > { %1889 = vrcp.f32 %v2629_v18  ;;  %1174 = vperm.xlu1 %1828, %v1880_v17  }
 0x2e3   : > { %1891 = vrcp.f32 %v2613_v13 }
 0x2e4   : > { %v1882_v20 = vpop.eup %1881  ;;  %1893 = vrcp.f32 %v2627_v16 }
 0x2e5   : > { %v1884_v22 = vpop.eup %1883  ;;  %1199 = vperm.xlu0 %1827, %v1882_v20   ;;  %1895 = vrcp.f32 %v2610_v12 }
 0x2e6   : > { %1179 = vperm.xlu1 %1828, %v1884_v22   ;;  %v1886_v23 = vpop.eup %1885  ;;  %1897 = vrcp.f32 %v2625_v33 }
 0x2e7   : > { %v1888_v30 = vpop.eup %1887  ;;  %1899 = vrcp.f32 %v2622_v32 }
 0x2e9   : > { %1209 = vperm.xlu0 %1827, %v1886_v23  }
 0x2ea   : > { %1189 = vperm.xlu1 %1828, %v1888_v30  }
 0x2ec   : > { %v1890_v28 = vpop.eup %1889 }
 0x2ed   : > { %v1892_v31 = vpop.eup %1891  ;;  %1219 = vperm.xlu0 %1827, %v1890_v28  }
 0x2ee   : > { %1194 = vperm.xlu1 %1828, %v1892_v31   ;;  %v1894_v34 = vpop.eup %1893 }
 0x2ef   : > { %v1896_v35 = vpop.eup %1895 }
 0x2f0   : > { %v1898_v36 = vpop.eup %1897 }
 0x2f1   : > { %1229 = vperm.xlu0 %1827, %v1894_v34   ;;  %v1900_v37 = vpop.eup %1899 }
 0x2f2   : > { %1204 = vperm.xlu1 %1828, %v1896_v35  }
 0x2f6   : > { %1214 = vperm.xlu1 %1828, %v1898_v36  }
 0x2fa   : > { %1224 = vperm.xlu1 %1828, %v1900_v37  }
 0x351   : > { %v1165_v63 = vpop.permute.xlu1 %1164 }
 0x352   : > { %v1234_v9 = vmul.f32 %v2589_v61, %v1165_v63  ;;  %v1155_v40 = vpop.permute.xlu0 %1154 }
 0x353   : > { %v1232_v42 = vmul.f32 %v1155_v40, %v2592_v3 }
 0x354   : > { %v1258_v41 = vadd.f32 %v2639_v62, %v1234_v9 }
 0x355   : > { %v1170_v43 = vpop.permute.xlu1 %1169  ;;  %v1256_v47 = vadd.f32 %v2639_v62, %v1232_v42 }
 0x356   : > { %v1235_v45 = vmul.f32 %v2595_v4, %v1170_v43  ;;  %v1274_v46 = vmul.f32 0.01, %v1258_v41 }
 0x357   : > { %v1272_v29 = vmul.f32 0.01, %v1256_v47 }
 0x358   : > { %v1259_v48 = vadd.f32 %v2639_v62, %v1235_v45  ;;  %v1290_v52 = vmax.f32 %v1258_v41, %v1274_v46 }
 0x359   : > { %v1160_v49 = vpop.permute.xlu1 %1159  ;;  %v1288_v54 = vmax.f32 %v1256_v47, %v1272_v29 }
 0x35a   : > { %v1275_v50 = vmul.f32 0.01, %v1259_v48  ;;  %v1233_v51 = vmul.f32 %v1160_v49, %v2597_v5 }
 0x35c   : > { %v1291_v53 = vmax.f32 %v1259_v48, %v1275_v50  ;;  %v1257_v26 = vadd.f32 %v2639_v62, %v1233_v51 }
 0x35d   : > { %v1185_v27 = vpop.permute.xlu1 %1184 }
 0x35e   : > { %v1273_v44 = vmul.f32 0.01, %v1257_v26  ;;  %v1678_v24 = vpack.c.bf16 %v1291_v53, %v1290_v52  ;;  %v1238_v57 = vmul.f32 %v2600_v6, %v1185_v27 }
 0x360   : > { %v1289_v21 = vmax.f32 %v1257_v26, %v1273_v44  ;;  %v1262_v4 = vadd.f32 %v2639_v62, %v1238_v57 }
 0x361   : > { %v1175_v25 = vpop.permute.xlu1 %1174 }
 0x362   : > { %v1236_v55 = vmul.f32 %v1175_v25, %v2603_v0  ;;  %v1675_v56 = vpack.c.bf16 %v1289_v21, %v1288_v54 }
 0x364   : > { %v1260_v58 = vadd.f32 %v2639_v62, %v1236_v55  ;;  %1676 = vmatpush3.bf16.msra.mxu1 %v1675_v56  ;;  %v1200_v59 = vpop.permute.xlu0 %1199 }
 0x365   : > { %v1180_v60 = vpop.permute.xlu1 %1179  ;;  %1677 = vmatprep.subr.bf16.mxu1 %v2179_v19  ;;  %v1241_v3 = vmul.f32 %v1200_v59, %v2617_v38 }
 0x366   : > { %v1237_v61 = vmul.f32 %v1180_v60, %v2607_v7  ;;  %v1276_v5 = vmul.f32 0.01, %v1260_v58  ;;  %v1278_v7 = vmul.f32 0.01, %v1262_v4 }
 0x367   : > { %v1265_v15 = vadd.f32 %v2639_v62, %v1241_v3 }
 0x368   : > { %v1261_v2 = vadd.f32 %v2639_v62, %v1237_v61  ;;  %1679 = vmatpush3.bf16.msra.mxu1 %v1678_v24  ;;  %v1210_v0 = vpop.permute.xlu0 %1209  ;;  %v1292_v17 = vmax.f32 %v1260_v58, %v1276_v5  ;;  %v1294_v36 = vmax.f32 %v1262_v4, %v1278_v7 }
 0x369   : > { %v1190_v10 = vpop.permute.xlu1 %1189  ;;  %1680 = vmatprep.subr.bf16.mxu1 %v2179_v19  ;;  %v1243_v39 = vmul.f32 %v2615_v14, %v1210_v0  ;;  %v1281_v34 = vmul.f32 0.01, %v1265_v15 }
 0x36a   : > { %v1277_v6 = vmul.f32 0.01, %v1261_v2  ;;  %v1239_v11 = vmul.f32 %v2605_v1, %v1190_v10 }
 0x36b   : > { %v1267_v35 = vadd.f32 %v2639_v62, %v1243_v39 }
 0x36c   : > { %v1293_v38 = vmax.f32 %v1261_v2, %v1277_v6  ;;  %v1263_v20 = vadd.f32 %v2639_v62, %v1239_v11  ;;  %v1220_v22 = vpop.permute.xlu0 %1219 }
 0x36d   : > { %v1195_v23 = vpop.permute.xlu1 %1194  ;;  %v1245_v37 = vmul.f32 %v1220_v22, %v2629_v18  ;;  %v1283_v42 = vmul.f32 0.01, %v1267_v35 }
 0x36e   : > { %v1279_v30 = vmul.f32 0.01, %v1263_v20  ;;  %v1240_v28 = vmul.f32 %v1195_v23, %v2613_v13  ;;  %v1681_v31 = vpack.c.bf16 %v1293_v38, %v1292_v17  ;;  %v1297_v13 = vmax.f32 %v1265_v15, %v1281_v34 }
 0x36f   : > { %v1269_v43 = vadd.f32 %v2639_v62, %v1245_v37  ;;  %v1299_v51 = vmax.f32 %v1267_v35, %v1283_v42 }
 0x370   : > { %v1295_v1 = vmax.f32 %v1263_v20, %v1279_v30  ;;  %v1264_v14 = vadd.f32 %v2639_v62, %v1240_v28  ;;  %1682 = vmatpush3.bf16.msra.mxu1 %v1681_v31  ;;  %v1230_v8 = vpop.permute.xlu0 %1229 }
 0x371   : > { %v1205_v63 = vpop.permute.xlu1 %1204  ;;  %1683 = vmatprep.subr.bf16.mxu1 %v2179_v19  ;;  %v1247_v46 = vmul.f32 %v2627_v16, %v1230_v8 }
 0x372   : > { %v1280_v9 = vmul.f32 0.01, %v1264_v14  ;;  %v1242_v40 = vmul.f32 %v2610_v12, %v1205_v63  ;;  %v1684_v41 = vpack.c.bf16 %v1295_v1, %v1294_v36  ;;  %v1285_v12 = vmul.f32 0.01, %v1269_v43 }
 0x373   : > { %v1271_v52 = vadd.f32 %v2639_v62, %v1247_v46 }
 0x374   : > { %v1296_v45 = vmax.f32 %v1264_v14, %v1280_v9  ;;  %v1266_v18 = vadd.f32 %v2639_v62, %v1242_v40  ;;  %1685 = vmatpush3.bf16.msra.mxu1 %v1684_v41  ;;  %v1301_v24 = vmax.f32 %v1269_v43, %v1285_v12 }
 0x375   : > { %v1215_v47 = vpop.permute.xlu1 %1214  ;;  %1686 = vmatprep.subr.bf16.mxu1 %v2179_v19  ;;  %v1287_v54 = vmul.f32 0.01, %v1271_v52 }
 0x376   : > { %v1282_v48 = vmul.f32 0.01, %v1266_v18  ;;  %v1244_v49 = vmul.f32 %v1215_v47, %v2625_v33  ;;  %v1687_v50 = vpack.c.bf16 %v1297_v13, %v1296_v45 }
 0x377   : > { %v1303_v56 = vmax.f32 %v1271_v52, %v1287_v54 }
 0x378   : > { %v1298_v29 = vmax.f32 %v1266_v18, %v1282_v48  ;;  %v1268_v53 = vadd.f32 %v2639_v62, %v1244_v49  ;;  %1688 = vmatpush3.bf16.msra.mxu1 %v1687_v50 }
 0x379   : > { %v1225_v26 = vpop.permute.xlu1 %1224  ;;  %1689 = vmatprep.subr.bf16.mxu1 %v2179_v19 }
 0x37a   : > { %v1284_v16 = vmul.f32 0.01, %v1268_v53  ;;  %v1246_v27 = vmul.f32 %v2622_v32, %v1225_v26  ;;  %v1690_v44 = vpack.c.bf16 %v1299_v51, %v1298_v29  ;;  %v1304_v32 = vld [vmem:[#allocation11] sm:$0x3] }
 0x37c   : > { %v1300_v33 = vmax.f32 %v1268_v53, %v1284_v16  ;;  %v1270_v21 = vadd.f32 %v2639_v62, %v1246_v27  ;;  %1691 = vmatpush3.bf16.msra.mxu1 %v1690_v44 }
 0x37d   : > { %1692 = vmatprep.subr.bf16.mxu1 %v2179_v19 }
 0x37e   : > { %v1286_v25 = vmul.f32 0.01, %v1270_v21  ;;  %v1693_v55 = vpack.c.bf16 %v1301_v24, %v1300_v33 }
 0x380   : > { %v1302_v57 = vmax.f32 %v1270_v21, %v1286_v25  ;;  %1694 = vmatpush3.bf16.msra.mxu1 %v1693_v55 }
 0x381   : > { %1695 = vmatprep.subr.bf16.mxu1 %v2179_v19 }
 0x382   : > { %v1696_v58 = vpack.c.bf16 %v1303_v56, %v1302_v57 }
 0x384   : > { %1697 = vmatpush3.bf16.msra.mxu1 %v1696_v58 }
 0x387   : > { %1672 = vmatmul.mubr.f32.vlgmr.msra.gmra.mrb[0].mxu1 %v1304_v32 }
 0x45a   : > { %v1371_v19 = vpop.f32.mrb[0].mxu1 }
 0x45b   : > { %1376 = vst.msk [vmem:[%s352_s16] sm:$0x3] %vm1375_vm1, %v1371_v19  ;;  %v1673_v62 = vpop.f32.mrb[1].mxu1 }
 0x45c   : > { %2082 = shalt.err (!%p2079_p5)
}
 0x45d   : > { %s2083_s25 = scalar_lea.hbm %s2685_s20, 32  ;;  %s2087_s12 = scalar_lea.hbm %s2738_s6, 128 }
 0x45e   : > { %p2084_p6 = scmp.ne.s32.totalorder %s2685_s20, %s2083_s25  ;;  %p2088_p12 = scmp.lt.u32.totalorder %s2685_s20, %s2738_s6 }
 0x45f   : > { %p2089_p4 = scmp.lt.u32.totalorder %s2087_s12, %s2083_s25  ;;  %p2091_p13 = scmp.lt.u32.totalorder %s2083_s25, %s2685_s20 }
 0x460   : > { %p2085_p7 = pnand %p2084_p6, %p2764_p1 }
 0x461   : > { %p2090_p8 = por %p2089_p4, %p2088_p12 }
 0x462   : > { %p2086_p9 = pneg %p2085_p7 }
 0x463   : > { %p2092_p10 = por %p2091_p13, %p2090_p8 }
 0x465   : > { %p2093_p11 = pnand %p2092_p10, %p2086_p9 }
 0x467   : > { %2096 = shalt.err (!%p2093_p11)
}
 0x468   : > { %1722 = dma.vmem_to_hbm [thread:$0]  (%p2764_p1), %s2687_s14, 32, %s2685_s20, %s1378_s10  }
 0x469 PF: > { %p1759_p0 = scmp.ge.s32.totalorder %s2163_s26, 2  ;;  %s1405_s19 = sand.u32 1, %s2143_s21  }
 0x46a   : > { %p2765_p2 = scmp.ne.s32.totalorder %s2752_s9, 0  ;;  %s1406_s27 = scalar_lea.sflag [#allocation4], %s1405_s19 }
 0x46c   : > { %p1744_p3 = pnand %p1759_p0, %p2765_p2 }
 0x46e   : > { %2138 = dma.done.wait (!%p1744_p3), %s1406_s27, 32  }
 0x46f   : > { %2140 = vsyncadd (!%p1744_p3), %s1406_s27, 4294967264  ;;  %s23_s26 = sadd.s32 1, %s2163_s26   ;;  %s2766_s7 = sld [smem:[#allocation21_spill]] }
 0x470   : > { %p20_p5 = scmp.ge.s32.totalorder %s23_s26, 6   ;;  %s2767_s24 = sld [smem:[#allocation19_spill]] }
 0x471   : > { %s2768_s25 = sld [smem:[#allocation20_spill]]  ;;  %s2769_s21 = smov %s2147_s22 }
 0x472   : > { %s2770_s22 = smov %s2151_s23  ;;  %22 = sbr.rel (!%p20_p5) target bundleno = 10 (0xa), region = 108 }
 0x475   : > { %s2771_s23 = smov %s2766_s7 }
 0x479   :  { %1411 = vsyncpa [#allocation3], 1 }
 0x47a   :  { %1413 = vsyncpa [#allocation3 + $0x1], 1 }
 0x47b   :  { %1414 = vsyncpa [#allocation6], 1 }
 0x47c   :  { %1415 = vsyncpa [#allocation9], 1 }
 0x47d   :  { %1416 = vsyncpa [#allocation12], 1 }
 0x47e   :  { %1417 = vsyncpa [#allocation4], 1 }
 0x47f   :  { %1419 = vsyncpa [#allocation4 + $0x1], 1 }

</bundles_post_ra>
